<compile_context>
chip_gen: v6e
topology: v6e:2x2x1
jax: 0.10.0
libtpu: 0.0.40
codegen_flags: <defaults>
</compile_context>

<pallas_src>
import functools

import jax
import jax.numpy as jnp
from jax.experimental import pallas as pl
from jax.experimental.pallas import tpu as pltpu


def _self_attn_q_kernel(x_ref, w1_ref, w2_ref, o_ref, *, compute_dtype):
    # x_ref : (TB, S, D)  block of TB batch elements
    # w1_ref: (D, H)      full weight, pre-cast to compute_dtype (resident)
    # w2_ref: (1, H)      lane-dense row form of the (H, 1) weight (resident)
    # o_ref : (TB, D)
    TB, S, D = x_ref.shape
    H = w1_ref.shape[1]

    x = x_ref[...]                                      # (TB, S, D)
    x2d = x.reshape(TB * S, D)

    # inner_matrix + ReLU: one 2-D MXU matmul with M = TB*S rows, f32 accum.
    h = jnp.dot(x2d.astype(compute_dtype), w1_ref[...],
                preferred_element_type=jnp.float32)     # (TB*S, H) f32
    h = jnp.maximum(h, 0.0)

    # outer_matrix (output_dim == 1): contraction over H.
    if H >= 256:
        # Large H: route through the MXU (underused after the first matmul).
        s = jax.lax.dot_general(
            h.astype(compute_dtype), w2_ref[...],
            dimension_numbers=(((1,), (1,)), ((), ())),
            preferred_element_type=jnp.float32)         # (TB*S, 1)
        s = s.reshape(TB, S)
    else:
        # Small H: VPU multiply + cross-lane (XLU) reduce; scores lane-dense.
        # Mixed-precision multiply promotes to f32, so no per-step weight cast.
        s = jnp.sum(h.reshape(TB, S, H) * w2_ref[...].reshape(1, 1, H),
                    axis=-1)                            # (TB, S) f32

    # Softmax over the sequence axis (dim=1 of the original (B, S, 1) tensor);
    # numerator only here -- the denominator is applied after the weighted sum.
    m = jnp.max(s, axis=-1, keepdims=True)
    e = jnp.exp(s - m)                                  # (TB, S) f32 (EUP)
    denom = jnp.sum(e, axis=-1, keepdims=True)          # (TB, 1)

    # Weighted sum: out[b] = sum_s e[b,s] * x[b,s,:] -- VPU multiply + sublane
    # (XLU) reduce over S. Exactly TB*S*D MACs; VPU math stays f32.
    acc = jnp.sum(e[:, :, None] * x.astype(jnp.float32), axis=1)   # (TB, D)

    # Deferred normalization: scale TB*D values instead of TB*S. Exact divide
    # so f32 numerics match the PyTorch reference (pl.reciprocal(approx=True)
    # is available if the accuracy budget allows).
    o_ref[...] = (acc / denom).astype(o_ref.dtype)


def _vmem_capacity_bytes():
    try:
        return int(pltpu.get_tpu_info().vmem_capacity_bytes)
    except Exception:
        return 64 * 1024 * 1024     # conservative (v7x-sized) fallback


def self_attention_question(input_q, w1, w2, *, block_b=None,
                            compute_dtype=None, vmem_limit_bytes=None):
    """input_q: (B, S, D); w1: (D, H); w2: (H, 1)  ->  (B, D)."""
    B, S, D = input_q.shape
    H = w1.shape[1]
    assert w1.shape == (D, H) and w2.shape == (H, 1)

    if compute_dtype is None:
        # f32 default matches the PyTorch reference; pass jnp.bfloat16 on
        # v6e/v7x for ~2x MXU rate + halved weight traffic when acceptable.
        compute_dtype = jnp.float32

    # --- generation-aware VMEM budget (v7x: 64 MiB physical; v5e/v6e: 128) ---
    vmem_cap = _vmem_capacity_bytes()
    if vmem_limit_bytes is None:
        vmem_limit_bytes = (96 << 20) if vmem_cap >= (100 << 20) else (36 << 20)
    vmem_limit_bytes = int(min(vmem_limit_bytes, vmem_cap))

    x_bytes = jnp.dtype(input_q.dtype).itemsize
    w_bytes = jnp.dtype(compute_dtype).itemsize
    weight_bytes = (D * H + H) * w_bytes
    # Per-batch-element VMEM footprint inside one grid step.
    per_b = (2 * S * D * x_bytes          # x block (double-buffered)
             + S * H * 4                  # h (f32)
             + 4 * S * 4                  # scores / exp / softmax temporaries
             + S * D * 4                  # weighted-sum product tile (f32)
             + 2 * D * x_bytes)           # output row (double-buffered)
    budget = int(vmem_limit_bytes * 0.5) - weight_bytes   # headroom for spills
    max_bb = max(1, budget // per_b)

    if block_b is None:
        # Divisors of B that keep the (block_b, D) output store sublane-full
        # (multiple of 8) or cover the whole batch.
        candidates = [d for d in range(1, B + 1)
                      if B % d == 0 and (d % 8 == 0 or d == B)]
        fitting = [d for d in candidates if d <= max_bb] or [min(candidates)]
        # Smallest block filling the MXU M dim / amortizing per-step overhead
        # (TB*S >= ~512 rows); otherwise the biggest block that fits VMEM.
        good = [d for d in fitting if d * S >= 512]
        block_b = min(good) if good else max(fitting)
        # v7x has two TensorCores: keep grid_b >= 2 whenever halving the block
        # does not underfill the MXU M dimension.
        if block_b == B and B > 1:
            smaller = [d for d in fitting if d < B and d * S >= 128]
            if smaller:
                block_b = max(smaller)
    assert B % block_b == 0
    grid_b = B // block_b

    # Hoisted weight casts: resident tiles arrive already in compute_dtype.
    w1_c = w1.astype(compute_dtype)
    w2_row = w2.T.astype(compute_dtype)               # (1, H) lane-dense

    kernel = functools.partial(_self_attn_q_kernel, compute_dtype=compute_dtype)

    # TODO(synk): for very long S, add a second 'arbitrary' grid axis over S
    # with an online-softmax accumulator so the x block stays inside VMEM.
    return pl.pallas_call(
        kernel,
        out_shape=jax.ShapeDtypeStruct((B, D), input_q.dtype),
        grid_spec=pltpu.PrefetchScalarGridSpec(
            num_scalar_prefetch=0,
            grid=(grid_b,),
            in_specs=[
                pl.BlockSpec((block_b, S, D), lambda b: (b, 0, 0)),
                # Weights: constant index maps -> same resident tile each step.
                pl.BlockSpec((D, H), lambda b: (0, 0)),
                pl.BlockSpec((1, H), lambda b: (0, 0)),
            ],
            out_specs=pl.BlockSpec((block_b, D), lambda b: (b, 0)),
        ),
        compiler_params=pltpu.CompilerParams(
            dimension_semantics=("parallel",),
            vmem_limit_bytes=vmem_limit_bytes,
        ),
    )(input_q, w1_c, w2_row)


def _reference(input_q, w1, w2):
    # Pure-JAX reference mirroring the PyTorch forward exactly.
    q = input_q @ w1                       # inner_matrix (no bias)
    q = jnp.maximum(q, 0.0)                # ReLU
    q = q @ w2                             # outer_matrix (no bias), (B, S, 1)
    q = jax.nn.softmax(q, axis=1)          # Softmax(dim=1)
    q = jnp.squeeze(q, -1)[:, None, :]     # squeeze(-1), unsqueeze(1): (B,1,S)
    out = jnp.matmul(q, input_q)           # (B, 1, D)
    return jnp.squeeze(out, 1)             # (B, D)


if __name__ == "__main__":
    B, S, D, H = 16, 8, 32, 16             # batch, seq, input_dim, hidden_dim
    key = jax.random.PRNGKey(0)
    kx, k1, k2 = jax.random.split(key, 3)

    input_q = jax.random.normal(kx, (B, S, D), dtype=jnp.float32)
    # Deterministic "Linear" weights (nn.Linear(..., bias=False) equivalents)
    w1 = jax.random.normal(k1, (D, H), dtype=jnp.float32) * (1.0 / D) ** 0.5
    w2 = jax.random.normal(k2, (H, 1), dtype=jnp.float32) * (1.0 / H) ** 0.5

    out = self_attention_question(input_q, w1, w2)
    out = jax.block_until_ready(out)

    ref = _reference(input_q, w1, w2)
    assert out.shape == (B, D)
    assert jnp.allclose(out, ref, atol=1e-5, rtol=1e-5)

    print("KERNEL_OK")
</pallas_src>

<mosaic_0001>
module attributes {stable_mosaic.version = 11 : i64} {
  func.func @_self_attn_q_kernel(%arg0: i32, %arg1: memref<16x8x32xf32, #tpu.memory_space<vmem>>, %arg2: memref<32x16xf32, #tpu.memory_space<vmem>>, %arg3: memref<1x16xf32, #tpu.memory_space<vmem>>, %arg4: memref<16x32xf32, #tpu.memory_space<vmem>>) attributes {dimension_semantics = [#tpu.dimension_semantics<parallel>], iteration_bounds = array<i64: 1>, scalar_prefetch = 0 : i64, scratch_operands = 0 : i64, tpu.core_type = #tpu.core_type<tc>, window_params = [{transform_indices = @transform_0, window_bounds = array<i64: 16, 8, 32>}, {pipeline_mode = #tpu.pipeline_mode<synchronous>, transform_indices = @transform_1, window_bounds = array<i64: 32, 16>}, {pipeline_mode = #tpu.pipeline_mode<synchronous>, transform_indices = @transform_2, window_bounds = array<i64: 1, 16>}, {transform_indices = @transform_3, window_bounds = array<i64: 16, 32>}]} {
    %c0 = arith.constant 0 : index
    %c0_0 = arith.constant 0 : index
    %c0_1 = arith.constant 0 : index
    %0 = vector.load %arg1[%c0, %c0_0, %c0_1] : memref<16x8x32xf32, #tpu.memory_space<vmem>>, vector<16x8x32xf32>
    %1 = vector.shape_cast %0 : vector<16x8x32xf32> to vector<128x32xf32>
    %c0_2 = arith.constant 0 : index
    %c0_3 = arith.constant 0 : index
    %2 = vector.load %arg2[%c0_2, %c0_3] : memref<32x16xf32, #tpu.memory_space<vmem>>, vector<32x16xf32>
    %cst = arith.constant dense<0.000000e+00> : vector<128x16xf32>
    %3 = tpu.matmul %1, %2, %cst {dimension_numbers = #tpu.dot_dimension_numbers<[1], [0], [0], [1], [0, 0, 1, 1], [], []>} : vector<128x32xf32>, vector<32x16xf32>, vector<128x16xf32> -> vector<128x16xf32>
    %cst_4 = arith.constant 0.000000e+00 : f32
    %4 = vector.broadcast %cst_4 : f32 to vector<128x16xf32>
    %5 = arith.maximumf %3, %4 : vector<128x16xf32>
    %6 = vector.shape_cast %5 : vector<128x16xf32> to vector<16x8x16xf32>
    %c0_5 = arith.constant 0 : index
    %c0_6 = arith.constant 0 : index
    %7 = vector.load %arg3[%c0_5, %c0_6] : memref<1x16xf32, #tpu.memory_space<vmem>>, vector<1x16xf32>
    %8 = vector.shape_cast %7 : vector<1x16xf32> to vector<1x1x16xf32>
    %9 = vector.broadcast %8 : vector<1x1x16xf32> to vector<16x8x16xf32>
    %10 = arith.mulf %6, %9 : vector<16x8x16xf32>
    %cst_7 = arith.constant dense<0.000000e+00> : vector<16x8xf32>
    %11 = vector.multi_reduction <add>, %10, %cst_7 [2] : vector<16x8x16xf32> to vector<16x8xf32>
    %cst_8 = arith.constant dense<0xFF800000> : vector<16xf32>
    %12 = vector.multi_reduction <maximumf>, %11, %cst_8 [1] : vector<16x8xf32> to vector<16xf32>
    %13 = vector.shape_cast %12 : vector<16xf32> to vector<16x1xf32>
    %14 = vector.broadcast %13 : vector<16x1xf32> to vector<16x8xf32>
    %15 = arith.subf %11, %14 : vector<16x8xf32>
    %16 = math.exp %15 : vector<16x8xf32>
    %cst_9 = arith.constant dense<0.000000e+00> : vector<16xf32>
    %17 = vector.multi_reduction <add>, %16, %cst_9 [1] : vector<16x8xf32> to vector<16xf32>
    %18 = vector.shape_cast %17 : vector<16xf32> to vector<16x1xf32>
    %19 = vector.shape_cast %16 : vector<16x8xf32> to vector<16x8x1xf32>
    %20 = vector.broadcast %19 : vector<16x8x1xf32> to vector<16x8x32xf32>
    %21 = arith.mulf %20, %0 : vector<16x8x32xf32>
    %cst_10 = arith.constant dense<0.000000e+00> : vector<16x32xf32>
    %22 = vector.multi_reduction <add>, %21, %cst_10 [1] : vector<16x8x32xf32> to vector<16x32xf32>
    %23 = vector.broadcast %18 : vector<16x1xf32> to vector<16x32xf32>
    %24 = arith.divf %22, %23 : vector<16x32xf32>
    %c0_11 = arith.constant 0 : index
    %c0_12 = arith.constant 0 : index
    %25 = vector.load %arg4[%c0_11, %c0_12] : memref<16x32xf32, #tpu.memory_space<vmem>>, vector<16x32xf32>
    tpu.vector_store %arg4[%c0_11, %c0_12], %24 {strides = array<i32>} : memref<16x32xf32, #tpu.memory_space<vmem>>, vector<16x32xf32>,
    return
  }
  func.func @transform_0(%arg0: i32) -> (i32, i32, i32) {
    %c0_i32 = arith.constant 0 : i32
    %c0_i32_0 = arith.constant 0 : i32
    %c0_i32_1 = arith.constant 0 : i32
    return %arg0, %c0_i32, %c0_i32_0 : i32, i32, i32
  }
  func.func @transform_1(%arg0: i32) -> (i32, i32) {
    %c0_i32 = arith.constant 0 : i32
    %c0_i32_0 = arith.constant 0 : i32
    %c0_i32_1 = arith.constant 0 : i32
    return %c0_i32, %c0_i32_0 : i32, i32
  }
  func.func @transform_2(%arg0: i32) -> (i32, i32) {
    %c0_i32 = arith.constant 0 : i32
    %c0_i32_0 = arith.constant 0 : i32
    %c0_i32_1 = arith.constant 0 : i32
    return %c0_i32, %c0_i32_0 : i32, i32
  }
  func.func @transform_3(%arg0: i32) -> (i32, i32) {
    %c0_i32 = arith.constant 0 : i32
    %c0_i32_0 = arith.constant 0 : i32
    return %arg0, %c0_i32 : i32, i32
  }
}

</mosaic_0001>

<bundles_post_ra>
// kernel: tpu_custom_call.1
= control target key start
LH: loop header
LB: loop body
LE: loop exit
PB: predicated region body
PF: predicated region fallthrough
CT: control target
= control target key end

     0   :  { %8 = vsyncpa [#allocation3], 0  ;;  %s1602_s0 = inlined_call_operand.hbm [shape: f32[16,8,32], index: 0, kind: input, shape index: {}]   ;;  %s1603_s1 = inlined_call_operand.vmem [shape: f32[32,16], index: 1, kind: input, shape index: {}]   ;;  %s1604_s2 = inlined_call_operand.vmem [shape: f32[1,16], index: 2, kind: input, shape index: {}]   ;;  %s1605_s3 = inlined_call_operand.hbm [shape: f32[16,32], index: 3, kind: output, shape index: {}]  }
   0x1   :  { %9 = vsyncpa [#allocation4], 0  ;;  %s1188_s12 = smov [#allocation2]  }
   0x2   :  { %s15_s13 = sshll.u32 %s1188_s12, 4  ;;  %s16_s13 = int_to_ptr.vmem [resolvable:$true] %s15_s13 }
   0x3   :  { %s1152_s14 = scalar_lea.vmem %s16_s13, 2048  ;;  %p1157_p1 = scmp.lt.s32.totalorder %s16_s13, %s16_s13 }
   0x4   :  { %p1153_p0 = scmp.ne.s32.totalorder %s16_s13, %s1152_s14  ;;  %p1158_p2 = scmp.lt.s32.totalorder %s1152_s14, %s1152_s14 }
   0x6   :  { %p1159_p3 = por %p1158_p2, %p1157_p1 }
   0x8   :  { %p1160_p4 = pnand %p1159_p3, %p1153_p0 }
   0xa   :  { %1163 = shalt.err (!%p1160_p4)
}
   0xb   :  { %s1189_s15 = smov 128   ;;  %s1190_s16 = smov 8  }
   0xc   :  { %21 = dma.hbm_to_vmem [thread:$0]  %s1602_s0, 2048, %s16_s13, [#allocation3], %s1189_s15, %s1189_s15, %s1190_s16  }
   0xd   :  { %1184 = dma.done.wait [#allocation3], 2048  }
   0xe   :  { %1185 = vsyncadd [#allocation3], 4294965248  ;;  %v48_v0 = vld [vmem:[%s1603_s1 + $0x18] sm:$0xff]  ;;  %v47_v1 = vld [vmem:[%s1603_s1 + $0x10] sm:$0xff]  ;;  %vm49_vm0 = vcmask 261120   ;;  %vm282_vm1 = vcmask 130048  }
   0xf   :  { %1033 = vmatprep.subr.mxu0 %v48_v0  ;;  %1065 = vmatprep.subr.mxu1 %v48_v0  ;;  %v46_v2 = vld [vmem:[%s1603_s1 + $0x8] sm:$0xff]  ;;  %v45_v3 = vld [vmem:[%s1603_s1] sm:$0xff]  ;;  %v1239_v8 = vld [vmem:[#allocation2 + $0x10] sm:$0xff]  ;;  %vm413_vm2 = vcmask 1041409   ;;  %vm415_vm3 = vcmask 1042434   ;;  %vm417_vm4 = vcmask 1043459  }
  0x10   :  { %1034 = vmatpush3.msra.mxu0 %v48_v0  ;;  %1069 = vmatpush3.msra.mxu1 %v48_v0  ;;  %v1231_v4 = vld [vmem:[#allocation2] sm:$0xff]  ;;  %v1235_v6 = vld [vmem:[#allocation2 + $0x8] sm:$0xff]  ;;  %v1241_v9 = vld [vmem:[#allocation2 + $0x50] sm:$0xff]  ;;  %vm419_vm5 = vcmask 1044484   ;;  %vm421_vm6 = vcmask 1045509   ;;  %vm423_vm7 = vcmask 1046534  }
  0x11   :  { %1035 = vmatprep.subr.mxu0 %v47_v1  ;;  %1066 = vmatprep.subr.mxu1 %v47_v1  ;;  %v1233_v5 = vld [vmem:[#allocation2 + $0x40] sm:$0xff]  ;;  %v1237_v7 = vld [vmem:[#allocation2 + $0x48] sm:$0xff]  ;;  %v1253_v10 = vld [vmem:[#allocation2 + $0x18] sm:$0xff]  ;;  %vm425_vm8 = vcmask 1047559   ;;  %vm436_vm9 = vcmask 64512  }
  0x12   :  { %1036 = vmatpush3.msra.mxu0 %v47_v1  ;;  %1070 = vmatpush3.msra.mxu1 %v47_v1  ;;  %v1257_v11 = vld [vmem:[#allocation2 + $0x58] sm:$0xff]  ;;  %v1259_v12 = vld [vmem:[#allocation2 + $0x20] sm:$0xff]  ;;  %v1269_v14 = vld [vmem:[#allocation2 + $0x28] sm:$0xff] }
  0x13   :  { %1037 = vmatprep.subr.mxu0 %v46_v2  ;;  %1067 = vmatprep.subr.mxu1 %v46_v2  ;;  %v1261_v13 = vld [vmem:[#allocation2 + $0x60] sm:$0xff]  ;;  %v1273_v15 = vld [vmem:[#allocation2 + $0x68] sm:$0xff]  ;;  %v1275_v16 = vld [vmem:[#allocation2 + $0x30] sm:$0xff] }
  0x14   :  { %1038 = vmatpush3.msra.mxu0 %v46_v2  ;;  %1071 = vmatpush3.msra.mxu1 %v46_v2  ;;  %v1277_v17 = vld [vmem:[#allocation2 + $0x70] sm:$0xff]  ;;  %v1285_v18 = vld [vmem:[#allocation2 + $0x38] sm:$0xff]  ;;  %v1298_v22 = vld [vmem:[%s1604_s2] ss:$0 sm:$0xff]  ;;  %s1192_s2 = smov [#allocation5]  }
  0x15   :  { %1039 = vmatprep.subr.mxu0 %v45_v3  ;;  %1068 = vmatprep.subr.mxu1 %v45_v3  ;;  %v1289_v19 = vld [vmem:[#allocation2 + $0x78] sm:$0xff]  ;;  %s984_s27 = sshll.u32 %s1192_s2, 4  ;;  %s985_s27 = int_to_ptr.vmem [resolvable:$true] %s984_s27 }
  0x16   :  { %1040 = vmatpush3.msra.mxu0 %v45_v3  ;;  %1072 = vmatpush3.msra.mxu1 %v45_v3  ;;  %s1164_s28 = scalar_lea.vmem %s985_s27, 256  ;;  %p1169_p6 = scmp.lt.s32.totalorder %s985_s27, %s985_s27 }
  0x17   :  { %1041 = vmatprep.mubr.msk.f32.mxu0 %vm49_vm0, %v1231_v4  ;;  %1053 = vmatprep.mubr.msk.f32.mxu1 %vm49_vm0, %v1233_v5  ;;  %p1165_p5 = scmp.ne.s32.totalorder %s985_s27, %s1164_s28  ;;  %p1170_p7 = scmp.lt.s32.totalorder %s1164_s28, %s1164_s28 }
  0x18   :  { %1042 = vmatmul.mubr.msk.f32.vlgmr.msra.gmra.mxu0 %vm49_vm0, %v1235_v6  ;;  %1054 = vmatmul.mubr.msk.f32.vlgmr.msra.gmra.mxu1 %vm49_vm0, %v1237_v7 }
  0x19   :  { %1044 = vmatprep.mubr.msk.f32.mxu0 %vm49_vm0, %v1239_v8  ;;  %1056 = vmatprep.mubr.msk.f32.mxu1 %vm49_vm0, %v1241_v9  ;;  %p1171_p8 = por %p1170_p7, %p1169_p6 }
  0x1b   :  { %p1172_p9 = pnand %p1171_p8, %p1165_p5 }
  0x1c   :  { %1045 = vmatmul.mubr.msk.f32.gmra.mxu0 %vm49_vm0, %v1253_v10  ;;  %1057 = vmatmul.mubr.msk.f32.gmra.mxu1 %vm49_vm0, %v1257_v11 }
  0x1d   :  { %1047 = vmatprep.mubr.msk.f32.mxu0 %vm49_vm0, %v1259_v12  ;;  %1059 = vmatprep.mubr.msk.f32.mxu1 %vm49_vm0, %v1261_v13 }
  0x20   :  { %1048 = vmatmul.mubr.msk.f32.gmra.mxu0 %vm49_vm0, %v1269_v14  ;;  %1060 = vmatmul.mubr.msk.f32.gmra.mxu1 %vm49_vm0, %v1273_v15 }
  0x21   :  { %1050 = vmatprep.mubr.msk.f32.mxu0 %vm49_vm0, %v1275_v16  ;;  %1062 = vmatprep.mubr.msk.f32.mxu1 %vm49_vm0, %v1277_v17 }
  0x24   :  { %1051 = vmatmul.mubr.msk.f32.gmra.mxu0 %vm49_vm0, %v1285_v18  ;;  %1063 = vmatmul.mubr.msk.f32.gmra.mxu1 %vm49_vm0, %v1289_v19 }
  0xd8   :  { %v1043_v20 = vpop.f32.mrf.mxu0  ;;  %v1055_v21 = vpop.f32.mrf.mxu1 }
  0xd9   :  { %v244_v23 = vmax.f32 %v1043_v20, 0.0  ;;  %v252_v24 = vmax.f32 %v1055_v21, 0.0 }
  0xda   :  { %v164_v25 = vpop.f32.mrf.mxu0  ;;  %v204_v26 = vpop.f32.mrf.mxu1 }
  0xdb   :  { %v243_v27 = vmax.f32 %v164_v25, 0.0  ;;  %v251_v28 = vmax.f32 %v204_v26, 0.0  ;;  %v275_v29 = vmul.f32 %v1298_v22, %v252_v24  ;;  %v267_v30 = vmul.f32 %v1298_v22, %v244_v23 }
  0xdc   :  { %v1046_v31 = vpop.f32.mrf.mxu0  ;;  %v1058_v32 = vpop.f32.mrf.mxu1 }
  0xdd   :  { %v310_v33 = vsel %vm282_vm1, %v275_v29, 0.0  ;;  %v286_v34 = vsel %vm282_vm1, %v267_v30, 0.0  ;;  %v246_v35 = vmax.f32 %v1046_v31, 0.0  ;;  %v254_v36 = vmax.f32 %v1058_v32, 0.0 }
  0xde   :  { %311 = vadd.xlane.f32.xlu1 %v310_v33  ;;  %287 = vadd.xlane.f32.xlu0 %v286_v34  ;;  %v174_v37 = vpop.f32.mrf.mxu0  ;;  %v274_v38 = vmul.f32 %v1298_v22, %v251_v28  ;;  %v266_v39 = vmul.f32 %v1298_v22, %v243_v27  ;;  %v214_v40 = vpop.f32.mrf.mxu1 }
  0xdf   :  { %v253_v41 = vmax.f32 %v214_v40, 0.0  ;;  %v277_v42 = vmul.f32 %v1298_v22, %v254_v36  ;;  %v269_v43 = vmul.f32 %v1298_v22, %v246_v35  ;;  %v245_v47 = vmax.f32 %v174_v37, 0.0 }
  0xe0   :  { %v307_v44 = vsel %vm282_vm1, %v274_v38, 0.0  ;;  %v1049_v45 = vpop.f32.mrf.mxu0  ;;  %v1061_v46 = vpop.f32.mrf.mxu1  ;;  %v283_v48 = vsel %vm282_vm1, %v266_v39, 0.0 }
  0xe1   :  { %v316_v49 = vsel %vm282_vm1, %v277_v42, 0.0  ;;  %v292_v51 = vsel %vm282_vm1, %v269_v43, 0.0  ;;  %v248_v52 = vmax.f32 %v1049_v45, 0.0  ;;  %v256_v53 = vmax.f32 %v1061_v46, 0.0 }
  0xe2   :  { %308 = vadd.xlane.f32.xlu1 %v307_v44  ;;  %284 = vadd.xlane.f32.xlu0 %v283_v48  ;;  %v224_v50 = vpop.f32.mrf.mxu1  ;;  %v276_v54 = vmul.f32 %v1298_v22, %v253_v41  ;;  %v184_v55 = vpop.f32.mrf.mxu0  ;;  %v268_v57 = vmul.f32 %v1298_v22, %v245_v47  ;;  %v347_v42 = vlaneseq }
  0xe3   :  { %v255_v60 = vmax.f32 %v224_v50, 0.0  ;;  %v279_v61 = vmul.f32 %v1298_v22, %v256_v53  ;;  %v271_v62 = vmul.f32 %v1298_v22, %v248_v52  ;;  %v247_v0 = vmax.f32 %v184_v55, 0.0 }
  0xe4   :  { %v1064_v56 = vpop.f32.mrf.mxu1  ;;  %v1052_v58 = vpop.f32.mrf.mxu0  ;;  %v313_v59 = vsel %vm282_vm1, %v276_v54, 0.0  ;;  %v289_v1 = vsel %vm282_vm1, %v268_v57, 0.0  ;;  %v348_v44 = vand.u32 127, %v347_v42  ;;  %v1344_v45 = vshrl.u32 %v347_v42, 7 }
  0xe5   :  { %v322_v3 = vsel %vm282_vm1, %v279_v61, 0.0  ;;  %v298_v20 = vsel %vm282_vm1, %v271_v62, 0.0  ;;  %v278_v23 = vmul.f32 %v1298_v22, %v255_v60  ;;  %v270_v25 = vmul.f32 %v1298_v22, %v247_v0 }
  0xe6   :  { %317 = vadd.xlane.f32.xlu1 %v316_v49  ;;  %293 = vadd.xlane.f32.xlu0 %v292_v51  ;;  %v234_v63 = vpop.f32.mrf.mxu1  ;;  %v194_v2 = vpop.f32.mrf.mxu0  ;;  %v250_v28 = vmax.f32 %v1052_v58, 0.0  ;;  %v258_v29 = vmax.f32 %v1064_v56, 0.0  ;;  %v1351_v48 = vsub.s32 %v348_v44, %v1344_v45 }
  0xe7   :  { %v257_v21 = vmax.f32 %v234_v63, 0.0  ;;  %v249_v24 = vmax.f32 %v194_v2, 0.0  ;;  %v319_v27 = vsel %vm282_vm1, %v278_v23, 0.0  ;;  %v295_v31 = vsel %vm282_vm1, %v270_v25, 0.0 }
  0xe8   :  { %v281_v34 = vmul.f32 %v1298_v22, %v258_v29  ;;  %v273_v35 = vmul.f32 %v1298_v22, %v250_v28 }
  0xe9   :  { %v280_v26 = vmul.f32 %v1298_v22, %v257_v21  ;;  %v272_v30 = vmul.f32 %v1298_v22, %v249_v24 }
  0xea   :  { %314 = vadd.xlane.f32.xlu1 %v313_v59  ;;  %290 = vadd.xlane.f32.xlu0 %v289_v1  ;;  %v328_v36 = vsel %vm282_vm1, %v281_v34, 0.0  ;;  %v304_v37 = vsel %vm282_vm1, %v273_v35, 0.0 }
  0xeb   :  { %v325_v32 = vsel %vm282_vm1, %v280_v26, 0.0  ;;  %v301_v33 = vsel %vm282_vm1, %v272_v30, 0.0 }
  0xee   :  { %323 = vadd.xlane.f32.xlu1 %v322_v3  ;;  %299 = vadd.xlane.f32.xlu0 %v298_v20 }
  0xf2   :  { %320 = vadd.xlane.f32.xlu1 %v319_v27  ;;  %296 = vadd.xlane.f32.xlu0 %v295_v31 }
  0xf6   :  { %326 = vadd.xlane.f32.xlu1 %v325_v32  ;;  %302 = vadd.xlane.f32.xlu0 %v301_v33 }
  0xfa   :  { %329 = vadd.xlane.f32.xlu1 %v328_v36  ;;  %305 = vadd.xlane.f32.xlu0 %v304_v37 }
 0x167   :  { %v1332_v38 = vpop.xlane.xlu1 %311  ;;  %v1334_v39 = vpop.xlane.xlu0 %287 }
 0x168   :  { %v388_v51 = vrot.slane %v1332_v38, %v1351_v48  ;;  %v356_v56 = vrot.slane %v1334_v39, %v1351_v48 }
 0x16b   :  { %v1336_v40 = vpop.xlane.xlu1 %308  ;;  %v1338_v41 = vpop.xlane.xlu0 %284 }
 0x16c   :  { %v384_v52 = vrot.slane %v1336_v40, %v1351_v48  ;;  %v352_v53 = vrot.slane %v1338_v41, %v1351_v48 }
 0x16e   :  { %v427_v59 = vsel %vm413_vm2, %v388_v51, %v384_v52  ;;  %v414_v60 = vsel %vm413_vm2, %v356_v56, %v352_v53  ;;  %v1191_v53 = vmov 0  }
 0x16f   :  { %v1340_v43 = vpop.xlane.xlu1 %317  ;;  %v1342_v22 = vpop.xlane.xlu0 %293  ;;  %1079 = vset.pattern.permute.xlu1 %v1191_v53  ;;  %1078 = vset.pattern.permute.xlu0 %v1191_v53 }
 0x170   :  { %v396_v61 = vrot.slane %v1340_v43, %v1351_v48  ;;  %v364_v2 = vrot.slane %v1342_v22, %v1351_v48 }
 0x173   :  { %v1346_v46 = vpop.xlane.xlu1 %314  ;;  %v1348_v47 = vpop.xlane.xlu0 %290 }
 0x174   :  { %v392_v54 = vrot.slane %v1346_v46, %v1351_v48  ;;  %v360_v55 = vrot.slane %v1348_v47, %v1351_v48 }
 0x176   :  { %v428_v62 = vsel %vm415_vm3, %v392_v54, %v427_v59  ;;  %v416_v63 = vsel %vm415_vm3, %v360_v55, %v414_v60  ;;  %v447_v54 = vsub.s32 0, %v1344_v45  ;;  %v451_v55 = vsub.s32 1, %v1344_v45 }
 0x177   :  { %v1353_v49 = vpop.xlane.xlu1 %323  ;;  %v1355_v50 = vpop.xlane.xlu0 %299  ;;  %v429_v23 = vsel %vm417_vm4, %v396_v61, %v428_v62  ;;  %v418_v24 = vsel %vm417_vm4, %v364_v2, %v416_v63  ;;  %v463_v59 = vsub.s32 4, %v1344_v45  ;;  %v467_v63 = vsub.s32 5, %v1344_v45 }
 0x178   :  { %v404_v21 = vrot.slane %v1353_v49, %v1351_v48  ;;  %v372_v29 = vrot.slane %v1355_v50, %v1351_v48 }
 0x17b   :  { %v1369_v57 = vpop.xlane.xlu1 %320  ;;  %v1371_v58 = vpop.xlane.xlu0 %296 }
 0x17c   :  { %v400_v0 = vrot.slane %v1369_v57, %v1351_v48  ;;  %v368_v1 = vrot.slane %v1371_v58, %v1351_v48 }
 0x17e   :  { %v430_v25 = vsel %vm419_vm5, %v400_v0, %v429_v23  ;;  %v420_v26 = vsel %vm419_vm5, %v368_v1, %v418_v24  ;;  %v455_v23 = vsub.s32 2, %v1344_v45  ;;  %v471_v24 = vsub.s32 6, %v1344_v45 }
 0x17f   :  { %v1385_v3 = vpop.xlane.xlu1 %326  ;;  %v1387_v20 = vpop.xlane.xlu0 %302  ;;  %v431_v34 = vsel %vm421_vm6, %v404_v21, %v430_v25  ;;  %v422_v35 = vsel %vm421_vm6, %v372_v29, %v420_v26 }
 0x180   :  { %v408_v27 = vrot.slane %v1385_v3, %v1351_v48  ;;  %v376_v28 = vrot.slane %v1387_v20, %v1351_v48 }
 0x182   :  { %v432_v36 = vsel %vm423_vm7, %v408_v27, %v431_v34  ;;  %v424_v37 = vsel %vm423_vm7, %v376_v28, %v422_v35 }
 0x183   :  { %v1401_v30 = vpop.xlane.xlu1 %329  ;;  %v1403_v31 = vpop.xlane.xlu0 %305 }
 0x184   :  { %v412_v32 = vrot.slane %v1401_v30, %v1351_v48  ;;  %v380_v33 = vrot.slane %v1403_v31, %v1351_v48 }
 0x186   :  { %v433_v42 = vsel %vm425_vm8, %v412_v32, %v432_v36  ;;  %v426_v44 = vsel %vm425_vm8, %v380_v33, %v424_v37  ;;  %v475_v33 = vsub.s32 7, %v1344_v45 }
 0x187   :  { %v440_v51 = vsel %vm436_vm9, %v433_v42, -inf  ;;  %v437_v52 = vsel %vm436_vm9, %v426_v44, -inf }
 0x188   :  { %441 = vmax.xlane.f32.xlu1 %v440_v51  ;;  %438 = vmax.xlane.f32.xlu0 %v437_v52 }
 0x211   :  { %v1419_v56 = vpop.xlane.xlu0 %438  ;;  %v442_v60 = vpop.xlane.xlu1 %441 }
 0x212   :  { %v448_v61 = vrot.slane %v1419_v56, %v447_v54  ;;  %v452_v62 = vrot.slane %v1419_v56, %v451_v55  ;;  %v496_v0 = vrot.slane %v442_v60, %v463_v59  ;;  %v480_v1 = vrot.slane %v442_v60, %v447_v54 }
 0x213   :  { %v500_v25 = vrot.slane %v442_v60, %v467_v63  ;;  %v484_v27 = vrot.slane %v442_v60, %v451_v55  ;;  %v504_v34 = vrot.slane %v442_v60, %v471_v24  ;;  %v456_v37 = vrot.slane %v1419_v56, %v455_v23 }
 0x214   :  { %v525_v2 = vsub.f32 %v1338_v41, %v448_v61  ;;  %v526_v21 = vsub.f32 %v1334_v39, %v452_v62  ;;  %v537_v26 = vsub.f32 %v1369_v57, %v496_v0  ;;  %v533_v28 = vsub.f32 %v1336_v40, %v480_v1 }
 0x215   :  { %v538_v35 = vsub.f32 %v1353_v49, %v500_v25  ;;  %v534_v39 = vsub.f32 %v1332_v38, %v484_v27  ;;  %v459_v57 = vsub.s32 3, %v1344_v45  ;;  %v508_v42 = vrot.slane %v442_v60, %v475_v33 }
 0x216   :  { %v541_v29 = vmul.f32 1.442695, %v525_v2  ;;  %v543_v32 = vmul.f32 1.442695, %v526_v21  ;;  %v565_v41 = vmul.f32 1.442695, %v537_v26  ;;  %v539_v40 = vsub.f32 %v1385_v3, %v504_v34 }
 0x217   :  { %v557_v36 = vmul.f32 1.442695, %v533_v28  ;;  %v567_v44 = vmul.f32 1.442695, %v538_v35  ;;  %v488_v51 = vrot.slane %v442_v60, %v455_v23  ;;  %v559_v52 = vmul.f32 1.442695, %v534_v39 }
 0x218   :  { %1080 = vpow2.f32 %v541_v29  ;;  %v527_v49 = vsub.f32 %v1348_v47, %v456_v37  ;;  %v540_v53 = vsub.f32 %v1401_v30, %v508_v42  ;;  %v569_v38 = vmul.f32 1.442695, %v539_v40 }
 0x219   :  { %1082 = vpow2.f32 %v543_v32  ;;  %v535_v54 = vsub.f32 %v1346_v46, %v488_v51  ;;  %v460_v55 = vrot.slane %v1419_v56, %v459_v57  ;;  %v492_v62 = vrot.slane %v442_v60, %v459_v57 }
 0x21a   :  { %1084 = vpow2.f32 %v565_v41  ;;  %v545_v45 = vmul.f32 1.442695, %v527_v49  ;;  %v571_v61 = vmul.f32 1.442695, %v540_v53  ;;  %v464_v46 = vrot.slane %v1419_v56, %v463_v59 }
 0x21b   :  { %1086 = vpow2.f32 %v557_v36  ;;  %v561_v0 = vmul.f32 1.442695, %v535_v54  ;;  %v528_v1 = vsub.f32 %v1342_v22, %v460_v55  ;;  %v536_v30 = vsub.f32 %v1340_v43, %v492_v62 }
 0x21c   :  { %1088 = vpow2.f32 %v567_v44  ;;  %v468_v26 = vrot.slane %v1419_v56, %v467_v63  ;;  %v529_v22 = vsub.f32 %v1371_v58, %v464_v46  ;;  %v472_v43 = vrot.slane %v1419_v56, %v471_v24 }
 0x21d   :  { %1090 = vpow2.f32 %v559_v52  ;;  %v547_v21 = vmul.f32 1.442695, %v528_v1  ;;  %v563_v60 = vmul.f32 1.442695, %v536_v30  ;;  %v476_v35 = vrot.slane %v1419_v56, %v475_v33 }
 0x21e   :  { %1092 = vpow2.f32 %v569_v38  ;;  %v530_v59 = vsub.f32 %v1355_v50, %v468_v26  ;;  %v549_v29 = vmul.f32 1.442695, %v529_v22  ;;  %v531_v63 = vsub.f32 %v1387_v20, %v472_v43 }
 0x21f   :  { %1094 = vpow2.f32 %v545_v45  ;;  %v532_v39 = vsub.f32 %v1403_v31, %v476_v35 }
 0x220   :  { %1096 = vpow2.f32 %v571_v61  ;;  %v551_v58 = vmul.f32 1.442695, %v530_v59  ;;  %v553_v24 = vmul.f32 1.442695, %v531_v63 }
 0x221   :  { %1098 = vpow2.f32 %v561_v0  ;;  %v555_v50 = vmul.f32 1.442695, %v532_v39 }
 0x222   :  { %1100 = vpow2.f32 %v547_v21 }
 0x223   :  { %1102 = vpow2.f32 %v563_v60 }
 0x224   :  { %1104 = vpow2.f32 %v549_v29 }
 0x225   :  { %v1081_v3 = vpop.eup %1080  ;;  %1106 = vpow2.f32 %v551_v58 }
 0x226   :  { %v1083_v2 = vpop.eup %1082  ;;  %590 = vperm.xlu0 %1078, %v1081_v3   ;;  %1108 = vpow2.f32 %v553_v24 }
 0x227   :  { %593 = vperm.xlu1 %1079, %v1083_v2   ;;  %v1085_v47 = vpop.eup %1084  ;;  %1110 = vpow2.f32 %v555_v50 }
 0x228   :  { %v1087_v23 = vpop.eup %1086 }
 0x229   :  { %v1089_v25 = vpop.eup %1088 }
 0x22a   :  { %626 = vperm.xlu0 %1078, %v1085_v47   ;;  %v1091_v27 = vpop.eup %1090 }
 0x22b   :  { %614 = vperm.xlu1 %1079, %v1087_v23   ;;  %v1093_v28 = vpop.eup %1092 }
 0x22c   :  { %v1095_v32 = vpop.eup %1094 }
 0x22d   :  { %v1097_v34 = vpop.eup %1096 }
 0x22e   :  { %629 = vperm.xlu0 %1078, %v1089_v25   ;;  %v1099_v41 = vpop.eup %1098 }
 0x22f   :  { %617 = vperm.xlu1 %1079, %v1091_v27   ;;  %v1101_v36 = vpop.eup %1100 }
 0x230   :  { %v1103_v37 = vpop.eup %1102 }
 0x231   :  { %v1105_v57 = vpop.eup %1104 }
 0x232   :  { %632 = vperm.xlu0 %1078, %v1093_v28   ;;  %v1107_v56 = vpop.eup %1106 }
 0x233   :  { %596 = vperm.xlu1 %1079, %v1095_v32   ;;  %v1109_v20 = vpop.eup %1108 }
 0x234   :  { %v1111_v33 = vpop.eup %1110 }
 0x236   :  { %635 = vperm.xlu0 %1078, %v1097_v34  }
 0x237   :  { %620 = vperm.xlu1 %1079, %v1099_v41  }
 0x23b   :  { %599 = vperm.xlu1 %1079, %v1101_v36  }
 0x23f   :  { %623 = vperm.xlu1 %1079, %v1103_v37  }
 0x243   :  { %602 = vperm.xlu1 %1079, %v1105_v57  }
 0x247   :  { %605 = vperm.xlu1 %1079, %v1107_v56  }
 0x24b   :  { %608 = vperm.xlu1 %1079, %v1109_v20  }
 0x24f   :  { %611 = vperm.xlu1 %1079, %v1111_v33  }
 0x2a1   :  { %v591_v31 = vpop.permute.xlu0 %590 }
 0x2a2   :  { %v594_v42 = vpop.permute.xlu1 %593  ;;  %v640_v27 = vrot.slane %v591_v31, %v1351_v48 }
 0x2a3   :  { %v644_v22 = vrot.slane %v594_v42, %v1351_v48 }
 0x2a5   :  { %v627_v51 = vpop.permute.xlu0 %626  ;;  %v701_v58 = vsel %vm413_vm2, %v644_v22, %v640_v27 }
 0x2a6   :  { %v615_v40 = vpop.permute.xlu1 %614  ;;  %v688_v2 = vrot.slane %v627_v51, %v1351_v48 }
 0x2a7   :  { %v672_v45 = vrot.slane %v615_v40, %v1351_v48 }
 0x2a9   :  { %v630_v53 = vpop.permute.xlu0 %629 }
 0x2aa   :  { %v618_v44 = vpop.permute.xlu1 %617  ;;  %v692_v46 = vrot.slane %v630_v53, %v1351_v48 }
 0x2ab   :  { %v676_v54 = vrot.slane %v618_v44, %v1351_v48 }
 0x2ad   :  { %v1461_v61 = vpop.permute.xlu0 %632  ;;  %v708_v62 = vsel %vm413_vm2, %v676_v54, %v672_v45  ;;  %v747_v45 = vmul.f32 %v615_v40, %v1233_v5 }
 0x2ae   :  { %v1451_v52 = vpop.permute.xlu1 %596  ;;  %v696_v25 = vrot.slane %v1461_v61, %v1351_v48  ;;  %v753_v27 = vmul.f32 %v1461_v61, %v1277_v17 }
 0x2af   :  { %v648_v59 = vrot.slane %v1451_v52, %v1351_v48 }
 0x2b1   :  { %v1475_v23 = vpop.permute.xlu0 %635  ;;  %v702_v39 = vsel %vm415_vm3, %v648_v59, %v701_v58 }
 0x2b2   :  { %v1453_v49 = vpop.permute.xlu1 %620  ;;  %v700_v28 = vrot.slane %v1475_v23, %v1351_v48 }
 0x2b3   :  { %v680_v55 = vrot.slane %v1453_v49, %v1351_v48 }
 0x2b5   :  { %v709_v1 = vsel %vm415_vm3, %v680_v55, %v708_v62  ;;  %v739_v55 = vmul.f32 %v591_v31, %v1231_v4  ;;  %v751_v62 = vmul.f32 %v627_v51, %v1261_v13 }
 0x2b6   :  { %v1455_v38 = vpop.permute.xlu1 %599 }
 0x2b7   :  { %v652_v29 = vrot.slane %v1455_v38, %v1351_v48 }
 0x2b9   :  { %v703_v36 = vsel %vm417_vm4, %v652_v29, %v702_v39 }
 0x2ba   :  { %v1463_v3 = vpop.permute.xlu1 %623 }
 0x2bb   :  { %v684_v0 = vrot.slane %v1463_v3, %v1351_v48 }
 0x2bd   :  { %v710_v47 = vsel %vm417_vm4, %v684_v0, %v709_v1  ;;  %v748_v0 = vmul.f32 %v618_v44, %v1237_v7  ;;  %v752_v1 = vmul.f32 %v630_v53, %v1273_v15 }
 0x2be   :  { %v1471_v30 = vpop.permute.xlu1 %602  ;;  %v711_v21 = vsel %vm419_vm5, %v688_v2, %v710_v47  ;;  %v755_v2 = vsel %vm49_vm0, %v739_v55, 0.0  ;;  %v811_v47 = vsel %vm49_vm0, %v747_v45, 0.0 }
 0x2bf   :  { %v712_v60 = vsel %vm421_vm6, %v692_v46, %v711_v21  ;;  %v656_v34 = vrot.slane %v1471_v30, %v1351_v48  ;;  %v839_v46 = vsel %vm49_vm0, %v751_v62, 0.0  ;;  %v818_v21 = vsel %vm49_vm0, %v748_v0, 0.0 }
 0x2c0   :  { %v713_v43 = vsel %vm423_vm7, %v696_v25, %v712_v60  ;;  %v846_v4 = vsel %vm49_vm0, %v752_v1, 0.0  ;;  %v756_v40 = vrot.slane %v755_v2, 4  ;;  %v812_v13 = vrot.slane %v811_v47, 4 }
 0x2c1   :  { %v714_v32 = vsel %vm425_vm8, %v700_v28, %v713_v43  ;;  %v704_v50 = vsel %vm419_vm5, %v656_v34, %v703_v36  ;;  %v840_v31 = vrot.slane %v839_v46, 4  ;;  %v819_v7 = vrot.slane %v818_v21, 4 }
 0x2c2   :  { %v1480_v26 = vpop.permute.xlu1 %605  ;;  %v720_v35 = vsel %vm436_vm9, %v714_v32, 0.0  ;;  %v847_v44 = vrot.slane %v846_v4, 4  ;;  %v757_v51 = vadd.f32 %v756_v40, %v755_v2  ;;  %v741_v60 = vmul.f32 %v1451_v52, %v1239_v8 }
 0x2c3   :  { %v660_v41 = vrot.slane %v1480_v26, %v1351_v48  ;;  %721 = vadd.xlane.f32.xlu0 %v720_v35  ;;  %v820_v53 = vadd.f32 %v819_v7, %v818_v21  ;;  %v749_v34 = vmul.f32 %v1453_v49, %v1241_v9  ;;  %v750_v8 = vmul.f32 %v1463_v3, %v1257_v11 }
 0x2c4   :  { %v848_v25 = vadd.f32 %v847_v44, %v846_v4  ;;  %v758_v28 = vrot.slane %v757_v51, 2  ;;  %v769_v35 = vsel %vm49_vm0, %v741_v60, 0.0  ;;  %v754_v9 = vmul.f32 %v1475_v23, %v1289_v19 }
 0x2c5   :  { %v705_v56 = vsel %vm421_vm6, %v660_v41, %v704_v50  ;;  %v821_v29 = vrot.slane %v820_v53, 2  ;;  %v853_v41 = vsel %vm49_vm0, %v753_v27, 0.0  ;;  %v770_v36 = vrot.slane %v769_v35, 4 }
 0x2c6   :  { %v1495_v63 = vpop.permute.xlu1 %608  ;;  %v849_v32 = vrot.slane %v848_v25, 2  ;;  %v759_v52 = vadd.f32 %v758_v28, %v757_v51  ;;  %v825_v50 = vsel %vm49_vm0, %v749_v34, 0.0  ;;  %v860_v1 = vsel %vm49_vm0, %v754_v9, 0.0 }
 0x2c7   :  { %v664_v24 = vrot.slane %v1495_v63, %v1351_v48  ;;  %v822_v17 = vadd.f32 %v821_v29, %v820_v53  ;;  %v771_v62 = vadd.f32 %v770_v36, %v769_v35  ;;  %v743_v7 = vmul.f32 %v1471_v30, %v1259_v12 }
 0x2c8   :  { %v850_v61 = vadd.f32 %v849_v32, %v848_v25  ;;  %v760_v11 = vrot.slane %v759_v52, 1  ;;  %v745_v25 = vmul.f32 %v1495_v63, %v1275_v16 }
 0x2c9   :  { %v706_v20 = vsel %vm423_vm7, %v664_v24, %v705_v56  ;;  %v742_v56 = vmul.f32 %v1455_v38, %v1253_v10  ;;  %v823_v55 = vrot.slane %v822_v17, 1  ;;  %v772_v4 = vrot.slane %v771_v62, 2 }
 0x2ca   :  { %v1505_v37 = vpop.permute.xlu1 %611  ;;  %v851_v45 = vrot.slane %v850_v61, 1  ;;  %v1546_v2 = vadd.f32 %v760_v11, %v759_v52  ;;  %v783_v30 = vsel %vm49_vm0, %v743_v7, 0.0  ;;  %v797_v29 = vsel %vm49_vm0, %v745_v25, 0.0 }
 0x2cb   :  { %v668_v57 = vrot.slane %v1505_v37, %v1351_v48  ;;  %v740_v48 = vmul.f32 %v594_v42, %v1235_v6  ;;  %v813_v6 = vadd.f32 %v812_v13, %v811_v47  ;;  %v841_v42 = vadd.f32 %v840_v31, %v839_v46 }
 0x2cc   :  { %v776_v23 = vsel %vm49_vm0, %v742_v56, 0.0  ;;  %v1552_v46 = vadd.f32 %v823_v55, %v822_v17  ;;  %v1554_v21 = vadd.f32 %v851_v45, %v850_v61  ;;  %v746_v27 = vmul.f32 %v1505_v37, %v1285_v18 }
 0x2cd   :  { %v707_v33 = vsel %vm425_vm8, %v668_v57, %v706_v20  ;;  %v762_v5 = vsel %vm49_vm0, %v740_v48, 0.0  ;;  %v814_v43 = vrot.slane %v813_v6, 2  ;;  %v842_v59 = vrot.slane %v841_v42, 2 }
 0x2ce   :  { %v717_v54 = vsel %vm436_vm9, %v707_v33, 0.0  ;;  %v763_v15 = vrot.slane %v762_v5, 4  ;;  %v854_v57 = vrot.slane %v853_v41, 4  ;;  %v832_v20 = vsel %vm49_vm0, %v750_v8, 0.0 }
 0x2cf   :  { %718 = vadd.xlane.f32.xlu1 %v717_v54  ;;  %v815_v39 = vadd.f32 %v814_v43, %v813_v6  ;;  %v843_v24 = vadd.f32 %v842_v59, %v841_v42  ;;  %v826_v54 = vrot.slane %v825_v50, 4  ;;  %v833_v48 = vrot.slane %v832_v20, 4 }
 0x2d0   :  { %v764_v22 = vadd.f32 %v763_v15, %v762_v5  ;;  %v855_v0 = vadd.f32 %v854_v57, %v853_v41  ;;  %v861_v5 = vrot.slane %v860_v1, 4  ;;  %v777_v13 = vrot.slane %v776_v23, 4 }
 0x2d1   :  { %v816_v3 = vrot.slane %v815_v39, 1  ;;  %v844_v33 = vrot.slane %v843_v24, 1  ;;  %v827_v47 = vadd.f32 %v826_v54, %v825_v50  ;;  %v834_v31 = vadd.f32 %v833_v48, %v832_v20 }
 0x2d2   :  { %v765_v58 = vrot.slane %v764_v22, 2  ;;  %v856_v40 = vrot.slane %v855_v0, 2  ;;  %v744_v15 = vmul.f32 %v1480_v26, %v1269_v14  ;;  %v1565_v14 = vadd.f32 %v772_v4, %v771_v62 }
 0x2d3   :  { %v1548_v10 = vadd.f32 %v816_v3, %v815_v39  ;;  %v1550_v38 = vadd.f32 %v844_v33, %v843_v24  ;;  %v828_v53 = vrot.slane %v827_v47, 2  ;;  %v835_v12 = vrot.slane %v834_v31, 2 }
 0x2d4   :  { %v1538_v49 = vadd.f32 %v765_v58, %v764_v22  ;;  %v862_v22 = vadd.f32 %v861_v5, %v860_v1  ;;  %v790_v26 = vsel %vm49_vm0, %v744_v15, 0.0  ;;  %v857_v16 = vadd.f32 %v856_v40, %v855_v0 }
 0x2d5   :  { %v778_v63 = vadd.f32 %v777_v13, %v776_v23  ;;  %v829_v32 = vadd.f32 %v828_v53, %v827_v47  ;;  %v784_v18 = vrot.slane %v783_v30, 4  ;;  %v804_v37 = vsel %vm49_vm0, %v746_v27, 0.0 }
 0x2d6   :  { %v767_v19 = vrot.slane %v1538_v49, 1  ;;  %v863_v34 = vrot.slane %v862_v22, 2  ;;  %v836_v35 = vadd.f32 %v835_v12, %v834_v31  ;;  %v791_v58 = vrot.slane %v790_v26, 4 }
 0x2d7   :  { %v798_v8 = vrot.slane %v797_v29, 4  ;;  %v858_v24 = vrot.slane %v857_v16, 1  ;;  %v779_v17 = vrot.slane %v778_v63, 2  ;;  %v805_v61 = vrot.slane %v804_v37, 4 }
 0x2d8   :  { %v830_v50 = vrot.slane %v829_v32, 1  ;;  %v785_v57 = vadd.f32 %v784_v18, %v783_v30  ;;  %v864_v56 = vadd.f32 %v863_v34, %v862_v22  ;;  %v792_v20 = vadd.f32 %v791_v58, %v790_v26 }
 0x2d9   :  { %v837_v3 = vrot.slane %v836_v35, 1  ;;  %v799_v33 = vadd.f32 %v798_v8, %v797_v29  ;;  %v780_v55 = vadd.f32 %v779_v17, %v778_v63  ;;  %v806_v45 = vadd.f32 %v805_v61, %v804_v37 }
 0x2da   :  { %v774_v1 = vrot.slane %v1565_v14, 1  ;;  %v859_v48 = vadd.f32 %v858_v24, %v857_v16  ;;  %v786_v23 = vrot.slane %v785_v57, 2  ;;  %v831_v4 = vadd.f32 %v830_v50, %v829_v32 }
 0x2db   :  { %v865_v5 = vrot.slane %v864_v56, 1  ;;  %v793_v40 = vrot.slane %v792_v20, 2  ;;  %v838_v31 = vadd.f32 %v837_v3, %v836_v35  ;;  %v800_v7 = vrot.slane %v799_v33, 2 }
 0x2dc   :  { %v787_v25 = vadd.f32 %v786_v23, %v785_v57  ;;  %v775_v61 = vadd.f32 %v774_v1, %v1565_v14 }
 0x2dd   :  { %v866_v12 = vadd.f32 %v865_v5, %v864_v56  ;;  %v794_v30 = vadd.f32 %v793_v40, %v792_v20  ;;  %v801_v16 = vadd.f32 %v800_v7, %v799_v33 }
 0x2de   :  { %v788_v35 = vrot.slane %v787_v25, 1 }
 0x34c   :  { %v722_v44 = vpop.xlane.xlu0 %721 }
 0x34d   :  { %v876_v51 = vrot.slane %v722_v44, 1  ;;  %v877_v6 = vrot.slane %v722_v44, 2  ;;  %v878_v42 = vrot.slane %v722_v44, 3  ;;  %v879_v60 = vrot.slane %v722_v44, 4 }
 0x34e   :  { %1112 = vrcp.f32 %v722_v44  ;;  %v880_v28 = vrot.slane %v722_v44, 5  ;;  %v881_v43 = vrot.slane %v722_v44, 6  ;;  %v882_v59 = vrot.slane %v722_v44, 7 }
 0x34f   :  { %1114 = vrcp.f32 %v876_v51  ;;  %v781_v51 = vrot.slane %v780_v55, 1 }
 0x350   :  { %1116 = vrcp.f32 %v877_v6  ;;  %v807_v6 = vrot.slane %v806_v45, 2 }
 0x351   :  { %1118 = vrcp.f32 %v878_v42  ;;  %v782_v56 = vadd.f32 %v781_v51, %v780_v55 }
 0x352   :  { %1120 = vrcp.f32 %v879_v60  ;;  %v808_v18 = vadd.f32 %v807_v6, %v806_v45 }
 0x353   :  { %1122 = vrcp.f32 %v880_v28 }
 0x354   :  { %1124 = vrcp.f32 %v881_v43  ;;  %v809_v20 = vrot.slane %v808_v18, 1 }
 0x355   :  { %1126 = vrcp.f32 %v882_v59 }
 0x356   :  { %v810_v5 = vadd.f32 %v809_v20, %v808_v18 }
 0x358   :  { %v719_v41 = vpop.xlane.xlu1 %718 }
 0x359   :  { %v869_v52 = vrot.slane %v719_v41, 1  ;;  %v870_v39 = vrot.slane %v719_v41, 2  ;;  %v871_v36 = vrot.slane %v719_v41, 3  ;;  %v872_v9 = vrot.slane %v719_v41, 4 }
 0x35a   :  { %1128 = vrcp.f32 %v719_v41  ;;  %v873_v11 = vrot.slane %v719_v41, 5  ;;  %v874_v54 = vrot.slane %v719_v41, 6  ;;  %v875_v62 = vrot.slane %v719_v41, 7 }
 0x35b   :  { %1130 = vrcp.f32 %v869_v52  ;;  %v1113_v0 = vpop.eup %1112  ;;  %v768_v52 = vadd.f32 %v767_v19, %v1538_v49 }
 0x35c   :  { %1132 = vrcp.f32 %v870_v39  ;;  %v1115_v47 = vpop.eup %1114  ;;  %v916_v60 = vmul.f32 %v1113_v0, %v1548_v10 }
 0x35d   :  { %1134 = vrcp.f32 %v871_v36  ;;  %v1117_v13 = vpop.eup %1116  ;;  %v918_v44 = vmul.f32 %v1115_v47, %v1552_v46  ;;  %v802_v36 = vrot.slane %v801_v16, 1 }
 0x35e   :  { %1136 = vrcp.f32 %v872_v9  ;;  %v1119_v15 = vpop.eup %1118  ;;  %v920_v42 = vmul.f32 %v1117_v13, %v831_v4 }
 0x35f   :  { %1138 = vrcp.f32 %v873_v11  ;;  %v1121_v53 = vpop.eup %1120  ;;  %v922_v22 = vmul.f32 %v1119_v15, %v838_v31  ;;  %v961_v27 = vrot.slane %v918_v44, 7  ;;  %v803_v23 = vadd.f32 %v802_v36, %v801_v16 }
 0x360   :  { %1140 = vrcp.f32 %v874_v54  ;;  %v1123_v28 = vpop.eup %1122  ;;  %v924_v43 = vmul.f32 %v1121_v53, %v1550_v38  ;;  %v963_v26 = vrot.slane %v920_v42, 6  ;;  %v789_v54 = vadd.f32 %v788_v35, %v787_v25 }
 0x361   :  { %1142 = vrcp.f32 %v875_v62  ;;  %v1125_v59 = vpop.eup %1124  ;;  %v926_v46 = vmul.f32 %v1123_v28, %v1554_v21  ;;  %v962_v63 = vsel %vm413_vm2, %v961_v27, %v916_v60  ;;  %v965_v29 = vrot.slane %v922_v22, 5 }
 0x362   :  { %v1127_v32 = vpop.eup %1126  ;;  %v928_v37 = vmul.f32 %v1125_v59, %v859_v48  ;;  %v964_v10 = vsel %vm415_vm3, %v963_v26, %v962_v63  ;;  %v967_v34 = vrot.slane %v924_v43, 4  ;;  %v795_v21 = vrot.slane %v794_v30, 1 }
 0x363   :  { %v930_v58 = vmul.f32 %v1127_v32, %v866_v12  ;;  %v966_v41 = vsel %vm417_vm4, %v965_v29, %v964_v10  ;;  %v969_v8 = vrot.slane %v926_v46, 3 }
 0x364   :  { %v968_v39 = vsel %vm419_vm5, %v967_v34, %v966_v41  ;;  %v971_v24 = vrot.slane %v928_v37, 2  ;;  %v796_v62 = vadd.f32 %v795_v21, %v794_v30 }
 0x365   :  { %v970_v50 = vsel %vm421_vm6, %v969_v8, %v968_v39  ;;  %v973_v57 = vrot.slane %v930_v58, 1 }
 0x366   :  { %v972_v3 = vsel %vm423_vm7, %v971_v24, %v970_v50 }
 0x367   :  { %v1129_v38 = vpop.eup %1128  ;;  %v974_v19 = vsel %vm425_vm8, %v973_v57, %v972_v3 }
 0x368   :  { %v1131_v17 = vpop.eup %1130  ;;  %v900_v0 = vmul.f32 %v1129_v38, %v1546_v2  ;;  %978 = vst.msk [vmem:[#allocation5 + $0x8] sm:$0xff] %vm49_vm0, %v974_v19 }
 0x369   :  { %v1133_v9 = vpop.eup %1132  ;;  %v902_v11 = vmul.f32 %v1131_v17, %v768_v52 }
 0x36a   :  { %v1135_v33 = vpop.eup %1134  ;;  %v904_v49 = vmul.f32 %v1133_v9, %v775_v61 }
 0x36b   :  { %v1137_v45 = vpop.eup %1136  ;;  %v906_v14 = vmul.f32 %v1135_v33, %v782_v56  ;;  %v947_v1 = vrot.slane %v902_v11, 7 }
 0x36c   :  { %v1139_v48 = vpop.eup %1138  ;;  %v908_v55 = vmul.f32 %v1137_v45, %v789_v54  ;;  %v949_v47 = vrot.slane %v904_v49, 6 }
 0x36d   :  { %v1141_v4 = vpop.eup %1140  ;;  %v910_v40 = vmul.f32 %v1139_v48, %v796_v62  ;;  %v948_v13 = vsel %vm413_vm2, %v947_v1, %v900_v0  ;;  %v951_v31 = vrot.slane %v906_v14, 5 }
 0x36e   :  { %v1143_v7 = vpop.eup %1142  ;;  %v912_v44 = vmul.f32 %v1141_v4, %v803_v23  ;;  %v950_v15 = vsel %vm415_vm3, %v949_v47, %v948_v13  ;;  %v953_v51 = vrot.slane %v908_v55, 4 }
 0x36f   :  { %v914_v2 = vmul.f32 %v1143_v7, %v810_v5  ;;  %v952_v6 = vsel %vm417_vm4, %v951_v31, %v950_v15  ;;  %v955_v42 = vrot.slane %v910_v40, 3 }
 0x370   :  { %v954_v53 = vsel %vm419_vm5, %v953_v51, %v952_v6  ;;  %v957_v25 = vrot.slane %v912_v44, 2 }
 0x371   :  { %v956_v60 = vsel %vm421_vm6, %v955_v42, %v954_v53  ;;  %v959_v22 = vrot.slane %v914_v2, 1 }
 0x372   :  { %v958_v27 = vsel %vm423_vm7, %v957_v25, %v956_v60 }
 0x373   :  { %v960_v28 = vsel %vm425_vm8, %v959_v22, %v958_v27 }
 0x374   :  { %977 = vst.msk [vmem:[#allocation5] sm:$0xff] %vm49_vm0, %v960_v28 }
 0x375   :  { %1175 = shalt.err (!%p1172_p9)
}
 0x376   :  { %990 = dma.vmem_to_hbm [thread:$0]  %s985_s27, 256, %s1605_s3, [#allocation4], %s1189_s15, %s1189_s15, %s1190_s16  }
 0x377   :  { %1186 = dma.done.wait [#allocation4], 256  }
 0x378   :  { %1187 = vsyncadd [#allocation4], 4294967040 }
 0x379   :  { %994 = vsyncpa [#allocation3], 1 }
 0x37a   :  { %995 = vsyncpa [#allocation4], 1 }

</bundles_post_ra>
